<compile_context>
chip_gen: v5e
topology: v5e:2x2
jax: 0.10.0
libtpu: 0.0.40
codegen_flags: <defaults>
</compile_context>

<pallas_src>
import jax
import jax.numpy as jnp
from jax import lax
from jax.experimental import pallas as pl
from jax.experimental.pallas import tpu as pltpu

FEAT_DIM = 2       # dce_loss feat_dim (== ip1 output width)
N_CENTERS = 10     # dce_loss n_classes
OUT_PAD = 128      # lane-dense output width (class dim padded to one full vreg lane row)
BN_EPS = 1e-5


def _round_up(x, m):
    return (x + m - 1) // m * m


def dcenet_kernel(x_ref, w_ref, b_ref, c2_ref, negcsq_ref, a_ref, out_ref):
    # x_ref: (TILE_B, F) tile of extracted features; params are small resident
    # blocks (same block index every grid step -> loaded once, stay in VMEM).
    x = x_ref[...]
    # ip1 with BN pre-folded into (w, b): z = x @ w_fold + b_fold  -> (TILE_B, 2)
    # (bf16 x is fine: promoted to f32 on-chip, accumulation stays f32.)
    z = jnp.dot(x, w_ref[...], preferred_element_type=jnp.float32) + b_ref[...]
    # PReLU (single shared slope), slope read as a scalar from SMEM.
    a = a_ref[0, 0]
    feat = jnp.where(z > 0, z, a * z)                        # (TILE_B, 2)
    # dce tail:  -(||f||^2 + ||c||^2 - 2 f.c)  ==  (2c).f - ||f||^2 - ||c||^2
    # feat_dim == 2, so a few VPU FMAs replace an MXU matmul / XLU reductions.
    f0 = feat[:, 0:1]                                        # (TILE_B, 1)
    f1 = feat[:, 1:2]                                        # (TILE_B, 1)
    c2 = c2_ref[...]                                         # (2, 128) = 2*centers, 0-padded
    fic = f0 * c2[0:1, :] + f1 * c2[1:2, :]                  # (TILE_B, 128)
    fsq = f0 * f0 + f1 * f1                                  # (TILE_B, 1)
    # Lane-dense store: lanes >= N_CENTERS hold garbage (-||f||^2) and are
    # sliced off in the wrapper.
    out_ref[...] = fic - fsq + negcsq_ref[...]               # = -dist (padded)


def fold_params(params):
    """One-time folding of eval-mode BN into the Linear + padded dce constants."""
    gamma, beta, rmean, rvar, w1, b1, prelu_a, centers = params
    scale = gamma * lax.rsqrt(rvar + BN_EPS)                       # (1, F)
    w_fold = w1 * scale.reshape(-1, 1)                             # (F, 2)
    b_fold = b1 + (beta - rmean * scale) @ w1                      # (1, 2)
    # Zero-pad the class dimension to OUT_PAD lanes (lane-dense output stores).
    c2 = jnp.zeros((FEAT_DIM, OUT_PAD), jnp.float32)
    c2 = c2.at[:, :N_CENTERS].set(2.0 * centers)                   # (2, 128)
    neg_csq = jnp.zeros((1, OUT_PAD), jnp.float32)
    neg_csq = neg_csq.at[:, :N_CENTERS].set(
        -jnp.sum(centers * centers, axis=0, keepdims=True))        # (1, 128)
    return w_fold, b_fold, c2, neg_csq, prelu_a


def dcenet_forward(x, params, n_classes, tile_b=None):
    """Returns distance[:, :n_classes] exactly as DCENet.forward (embed=False)."""
    B, F = x.shape
    w_fold, b_fold, c2, neg_csq, prelu_a = fold_params(params)
    itemsize = jnp.dtype(x.dtype).itemsize

    if tile_b is None:
        # ~4 MiB x tile (amortizes ~0.35 us/step overhead), capped at 4096 rows
        # and so that the grid keeps >= 4 steps when B is large enough
        # (pipelining depth / v7x megacore sharding both want multiple steps).
        tile_b = (4 << 20) // max(1, F * itemsize)
        steps4 = _round_up(-(-B // 4), 8)
        tile_b = max(8, min(tile_b, 4096, steps4))
    # Sublane alignment + never exceed the (8-aligned) batch.
    tile_b = max(8, _round_up(int(tile_b), 8))
    tile_b = min(tile_b, _round_up(B, 8))

    # No wrapper-side padding of x: ragged last block is handled by Pallas
    # (partial output blocks only write the in-bounds rows).
    grid = (pl.cdiv(B, tile_b),)

    # VMEM footprint: double-buffered x tile + double-buffered output tile
    # + tiny resident params.  Tie the limit to the real footprint (v5e scoped
    # default is 16 MiB; v7x physical VMEM is only 64 MiB).
    param_bytes = (F * FEAT_DIM + FEAT_DIM + FEAT_DIM * OUT_PAD + OUT_PAD + 1) * 4
    footprint = 2 * tile_b * F * itemsize + 2 * tile_b * OUT_PAD * 4 + param_bytes
    vmem_limit = int(footprint * 3 // 2) + (2 << 20)

    cost = pl.CostEstimate(
        flops=2 * B * F * FEAT_DIM + 6 * B * OUT_PAD,
        transcendentals=0,
        bytes_accessed=B * F * itemsize + B * OUT_PAD * 4 + param_bytes,
    )

    out = pl.pallas_call(
        dcenet_kernel,
        out_shape=jax.ShapeDtypeStruct((B, OUT_PAD), jnp.float32),
        grid_spec=pltpu.PrefetchScalarGridSpec(
            num_scalar_prefetch=0,
            grid=grid,
            in_specs=[
                pl.BlockSpec((tile_b, F), lambda i: (i, 0)),          # x tiles
                pl.BlockSpec((F, FEAT_DIM), lambda i: (0, 0)),        # folded W
                pl.BlockSpec((1, FEAT_DIM), lambda i: (0, 0)),        # folded b
                pl.BlockSpec((FEAT_DIM, OUT_PAD), lambda i: (0, 0)),  # 2*centers (padded)
                pl.BlockSpec((1, OUT_PAD), lambda i: (0, 0)),         # -||c||^2 (padded)
                pl.BlockSpec(memory_space=pltpu.MemorySpace.SMEM),    # prelu slope
            ],
            out_specs=pl.BlockSpec((tile_b, OUT_PAD), lambda i: (i, 0)),
        ),
        compiler_params=pltpu.CompilerParams(
            dimension_semantics=("parallel",),       # v7x megacore shards the batch
            vmem_limit_bytes=vmem_limit,
        ),
        cost_estimate=cost,
    )(x, w_fold, b_fold, c2, neg_csq, prelu_a)

    # Drop the lane padding (and nothing else: batch is never padded anymore).
    return out[:, :n_classes]


def reference_forward(x, params, n_classes):
    gamma, beta, rmean, rvar, w1, b1, prelu_a, centers = params
    xn = (x - rmean) / jnp.sqrt(rvar + BN_EPS) * gamma + beta
    z = xn @ w1 + b1
    feat = jnp.where(z > 0, z, prelu_a[0, 0] * z)
    fsq = jnp.sum(feat ** 2, axis=1, keepdims=True)
    csq = jnp.sum(centers ** 2, axis=0, keepdims=True)
    dist = fsq + csq - 2.0 * feat @ centers
    return (-dist)[:, :n_classes]


def init_params(key, feature_size):
    k1, k2, k3 = jax.random.split(key, 3)
    # BatchNorm1d defaults: weight=1, bias=0, running_mean=0, running_var=1.
    gamma = jnp.ones((1, feature_size), jnp.float32)
    beta = jnp.zeros((1, feature_size), jnp.float32)
    rmean = jnp.zeros((1, feature_size), jnp.float32)
    rvar = jnp.ones((1, feature_size), jnp.float32)
    # ip1: Linear(feature_size, 2) with kaiming_normal_ weights (fan_in = F).
    w1 = (jax.random.normal(k1, (feature_size, FEAT_DIM), jnp.float32)
          * jnp.sqrt(2.0 / feature_size))          # stored pre-transposed: (F, 2)
    bound = 1.0 / jnp.sqrt(feature_size)
    b1 = jax.random.uniform(k2, (1, FEAT_DIM), jnp.float32, -bound, bound)
    # PReLU default slope 0.25 (not touched by _weights_init).
    prelu_a = jnp.full((1, 1), 0.25, jnp.float32)
    # dce centers: (feat_dim=2, n_classes=10), kaiming_normal_ (fan_in = 10).
    centers = (jax.random.normal(k3, (FEAT_DIM, N_CENTERS), jnp.float32)
               * jnp.sqrt(2.0 / N_CENTERS))
    return (gamma, beta, rmean, rvar, w1, b1, prelu_a, centers)


if __name__ == "__main__":
    batch = 20          # deliberately not a multiple of the tile: ragged last block
    feature_size = 32
    n_classes = 10

    key = jax.random.PRNGKey(0)
    kx, kp = jax.random.split(key)
    # x = feature_extractor(images): (B, feature_size) features.
    x = jax.random.normal(kx, (batch, feature_size), jnp.float32)
    params = init_params(kp, feature_size)

    # small tile so the test exercises multiple grid steps + the ragged tail
    out = dcenet_forward(x, params, n_classes, tile_b=8)
    out = jax.block_until_ready(out)

    ref = reference_forward(x, params, n_classes)
    assert out.shape == (batch, n_classes)
    assert jnp.allclose(out, ref, atol=1e-4, rtol=1e-4), "mismatch vs reference"

    # also exercise the auto tile-size path (single big tile, grid of 1)
    out2 = jax.block_until_ready(dcenet_forward(x, params, n_classes))
    assert jnp.allclose(out2, ref, atol=1e-4, rtol=1e-4), "mismatch vs reference (auto tile)"

    print("KERNEL_OK")
</pallas_src>

<mosaic_0001>
module attributes {stable_mosaic.version = 11 : i64} {
  func.func @dcenet_kernel(%arg0: i32, %arg1: memref<8x32xf32, #tpu.memory_space<vmem>>, %arg2: memref<32x2xf32, #tpu.memory_space<vmem>>, %arg3: memref<1x2xf32, #tpu.memory_space<vmem>>, %arg4: memref<2x128xf32, #tpu.memory_space<vmem>>, %arg5: memref<1x128xf32, #tpu.memory_space<vmem>>, %arg6: memref<1x1xf32, #tpu.memory_space<smem>>, %arg7: memref<8x128xf32, #tpu.memory_space<vmem>>) attributes {dimension_semantics = [#tpu.dimension_semantics<parallel>], iteration_bounds = array<i64: 3>, scalar_prefetch = 0 : i64, scratch_operands = 0 : i64, tpu.core_type = #tpu.core_type<tc>, window_params = [{transform_indices = @transform_0, window_bounds = array<i64: 8, 32>}, {pipeline_mode = #tpu.pipeline_mode<synchronous>, transform_indices = @transform_1, window_bounds = array<i64: 32, 2>}, {pipeline_mode = #tpu.pipeline_mode<synchronous>, transform_indices = @transform_2, window_bounds = array<i64: 1, 2>}, {pipeline_mode = #tpu.pipeline_mode<synchronous>, transform_indices = @transform_3, window_bounds = array<i64: 2, 128>}, {pipeline_mode = #tpu.pipeline_mode<synchronous>, transform_indices = @transform_4, window_bounds = array<i64: 1, 128>}, {transform_indices = @transform_5, window_bounds = array<i64: 1, 1>}, {transform_indices = @transform_6, window_bounds = array<i64: 8, 128>}]} {
    %c0 = arith.constant 0 : index
    %c0_0 = arith.constant 0 : index
    %0 = vector.load %arg1[%c0, %c0_0] : memref<8x32xf32, #tpu.memory_space<vmem>>, vector<8x32xf32>
    %c0_1 = arith.constant 0 : index
    %c0_2 = arith.constant 0 : index
    %1 = vector.load %arg2[%c0_1, %c0_2] : memref<32x2xf32, #tpu.memory_space<vmem>>, vector<32x2xf32>
    %cst = arith.constant dense<0.000000e+00> : vector<8x2xf32>
    %2 = tpu.matmul %0, %1, %cst {dimension_numbers = #tpu.dot_dimension_numbers<[1], [0], [0], [1], [0, 0, 1, 1], [], []>} : vector<8x32xf32>, vector<32x2xf32>, vector<8x2xf32> -> vector<8x2xf32>
    %c0_3 = arith.constant 0 : index
    %c0_4 = arith.constant 0 : index
    %3 = vector.load %arg3[%c0_3, %c0_4] : memref<1x2xf32, #tpu.memory_space<vmem>>, vector<1x2xf32>
    %4 = vector.broadcast %3 : vector<1x2xf32> to vector<8x2xf32>
    %5 = arith.addf %2, %4 : vector<8x2xf32>
    %c0_5 = arith.constant 0 : index
    %c0_6 = arith.constant 0 : index
    %6 = memref.load %arg6[%c0_5, %c0_6] : memref<1x1xf32, #tpu.memory_space<smem>>
    %cst_7 = arith.constant 0.000000e+00 : f32
    %7 = vector.broadcast %cst_7 : f32 to vector<8x2xf32>
    %8 = arith.cmpf ogt, %5, %7 : vector<8x2xf32>
    %9 = vector.broadcast %6 : f32 to vector<8x2xf32>
    %10 = arith.mulf %9, %5 : vector<8x2xf32>
    %11 = arith.select %8, %5, %10 : vector<8x2xi1>, vector<8x2xf32>
    %12 = vector.extract_strided_slice %11 {offsets = [0, 0], sizes = [8, 1], strides = [1, 1]} : vector<8x2xf32> to vector<8x1xf32>
    %13 = vector.extract_strided_slice %11 {offsets = [0, 1], sizes = [8, 1], strides = [1, 1]} : vector<8x2xf32> to vector<8x1xf32>
    %c0_8 = arith.constant 0 : index
    %c0_9 = arith.constant 0 : index
    %14 = vector.load %arg4[%c0_8, %c0_9] : memref<2x128xf32, #tpu.memory_space<vmem>>, vector<2x128xf32>
    %15 = vector.extract_strided_slice %14 {offsets = [0, 0], sizes = [1, 128], strides = [1, 1]} : vector<2x128xf32> to vector<1x128xf32>
    %16 = vector.broadcast %12 : vector<8x1xf32> to vector<8x128xf32>
    %17 = vector.broadcast %15 : vector<1x128xf32> to vector<8x128xf32>
    %18 = arith.mulf %16, %17 : vector<8x128xf32>
    %19 = vector.extract_strided_slice %14 {offsets = [1, 0], sizes = [1, 128], strides = [1, 1]} : vector<2x128xf32> to vector<1x128xf32>
    %20 = vector.broadcast %13 : vector<8x1xf32> to vector<8x128xf32>
    %21 = vector.broadcast %19 : vector<1x128xf32> to vector<8x128xf32>
    %22 = arith.mulf %20, %21 : vector<8x128xf32>
    %23 = arith.addf %18, %22 : vector<8x128xf32>
    %24 = arith.mulf %12, %12 : vector<8x1xf32>
    %25 = arith.mulf %13, %13 : vector<8x1xf32>
    %26 = arith.addf %24, %25 : vector<8x1xf32>
    %27 = vector.broadcast %26 : vector<8x1xf32> to vector<8x128xf32>
    %28 = arith.subf %23, %27 : vector<8x128xf32>
    %c0_10 = arith.constant 0 : index
    %c0_11 = arith.constant 0 : index
    %29 = vector.load %arg5[%c0_10, %c0_11] : memref<1x128xf32, #tpu.memory_space<vmem>>, vector<1x128xf32>
    %30 = vector.broadcast %29 : vector<1x128xf32> to vector<8x128xf32>
    %31 = arith.addf %28, %30 : vector<8x128xf32>
    %c0_12 = arith.constant 0 : index
    %c0_13 = arith.constant 0 : index
    %32 = vector.load %arg7[%c0_12, %c0_13] : memref<8x128xf32, #tpu.memory_space<vmem>>, vector<8x128xf32>
    tpu.vector_store %arg7[%c0_12, %c0_13], %31 {strides = array<i32>} : memref<8x128xf32, #tpu.memory_space<vmem>>, vector<8x128xf32>,
    return
  }
  func.func @transform_0(%arg0: i32) -> (i32, i32) {
    %c0_i32 = arith.constant 0 : i32
    %c0_i32_0 = arith.constant 0 : i32
    return %arg0, %c0_i32 : i32, i32
  }
  func.func @transform_1(%arg0: i32) -> (i32, i32) {
    %c0_i32 = arith.constant 0 : i32
    %c0_i32_0 = arith.constant 0 : i32
    %c0_i32_1 = arith.constant 0 : i32
    return %c0_i32, %c0_i32_0 : i32, i32
  }
  func.func @transform_2(%arg0: i32) -> (i32, i32) {
    %c0_i32 = arith.constant 0 : i32
    %c0_i32_0 = arith.constant 0 : i32
    %c0_i32_1 = arith.constant 0 : i32
    return %c0_i32, %c0_i32_0 : i32, i32
  }
  func.func @transform_3(%arg0: i32) -> (i32, i32) {
    %c0_i32 = arith.constant 0 : i32
    %c0_i32_0 = arith.constant 0 : i32
    %c0_i32_1 = arith.constant 0 : i32
    return %c0_i32, %c0_i32_0 : i32, i32
  }
  func.func @transform_4(%arg0: i32) -> (i32, i32) {
    %c0_i32 = arith.constant 0 : i32
    %c0_i32_0 = arith.constant 0 : i32
    %c0_i32_1 = arith.constant 0 : i32
    return %c0_i32, %c0_i32_0 : i32, i32
  }
  func.func @transform_5(%arg0: i32) -> (i32, i32) {
    %c0_i32 = arith.constant 0 : i32
    %c0_i32_0 = arith.constant 0 : i32
    %c0_i32_1 = arith.constant 0 : i32
    return %c0_i32, %c0_i32_0 : i32, i32
  }
  func.func @transform_6(%arg0: i32) -> (i32, i32) {
    %c0_i32 = arith.constant 0 : i32
    %c0_i32_0 = arith.constant 0 : i32
    return %arg0, %c0_i32 : i32, i32
  }
}

</mosaic_0001>

<bundles_post_ra>
// kernel: tpu_custom_call.1
= control target key start
LH: loop header
LB: loop body
LE: loop exit
PB: predicated region body
PF: predicated region fallthrough
CT: control target
= control target key end

     0   :  { %s663_s0 = inlined_call_operand.vmem [shape: f32[20,32], index: 0, kind: input, shape index: {}]   ;;  %s664_s1 = inlined_call_operand.vmem [shape: f32[32,2], index: 1, kind: input, shape index: {}]   ;;  %s665_s2 = inlined_call_operand.vmem [shape: f32[1,2], index: 2, kind: input, shape index: {}]   ;;  %s666_s3 = inlined_call_operand.vmem [shape: f32[2,128], index: 3, kind: input, shape index: {}]   ;;  %s667_s4 = inlined_call_operand.vmem [shape: f32[1,128], index: 4, kind: input, shape index: {}]   ;;  %s668_s5 = inlined_call_operand.<no memory space> [shape: f32[1,1], index: 5, kind: input, shape index: {}]   ;;  %s669_s6 = inlined_call_operand.hbm [shape: f32[20,128], index: 6, kind: output, shape index: {}]  }
   0x1   :  { %11 = sst [smem:[#allocation2]] %s668_s5 }
   0x2   :  { %12 = vsyncpa [#allocation4], 0 }
   0x3   :  { %14 = vsyncpa [#allocation4 + $0x1], 0  ;;  %s557_s23 = smov 0   ;;  %s559_s24 = smov 0  }
   0x4   :  { %s561_s25 = smov 0   ;;  %s563_s26 = smov 0  }
   0x5 LB: > { %s578_s5 = sadd.s32 4294967295, %s514_s26   ;;  %s394_s27 = sadd.s32 4294967294, %s514_s26   ;;  %s514_s26 = sphi %s563_s26, %s675_s26   ;;  %s510_s25 = sphi %s561_s25, %s674_s25   ;;  %s506_s24 = sphi %s559_s24, %s673_s24   ;;  %s502_s23 = sphi %s557_s23, %s672_s23  }
   0x6   : > { %s582_s28 = sadd.s32 1, %s514_s26   ;;  %s158_s29 = sadd.s32 1, %s510_s25 }
   0x7   : > { %s155_s30 = ssub.s32 %s514_s26, %s582_s28  ;;  %p168_p0 = scmp.ne.s32.totalorder %s510_s25, %s506_s24 }
   0x8   : > { %p156_p1 = scmp.eq.s32.totalorder %s155_s30, 0  ;;  %p169_p2 = scmp.eq.s32.totalorder %s578_s5, 2 }
   0x9   : > { %p174_p3 = scmp.ne.s32.totalorder %s506_s24, %s502_s23  ;;  %p175_p4 = scmp.eq.s32.totalorder %s394_s27, 2 }
   0xa   : > { %s593_s7 = scalar_select %p156_p1, %s510_s25, %s158_s29  }
   0xb   : > { %p595_p5 = por %p169_p2, %p168_p0  ;;  %p599_p6 = por %p175_p4, %p174_p3 }
   0xc   : > { %p397_p7 = scmp.ge.s32.totalorder %s514_s26, 1  ;;  %p215_p8 = scmp.lt.s32.totalorder %s514_s26, 4 }
   0xe   : > { %p216_p9 = pnand %p397_p7, %p215_p8 }
   0xf   : > { %p244_p10 = scmp.lt.s32.totalorder (!%p216_p9), %s578_s5, 2  ;;  %s281_s27 = sld [smem:[#allocation2]] (!%p216_p9) }
  0x10   : > { %219 = sbr.rel (%p216_p9) target bundleno = 401 (0x191), region = 44  ;;  %s518_s10 = smov (!%p216_p9), 127  }
  0x11   : > { %s241_s13 = sand.u32 (!%p216_p9), 1, %s506_s24   ;;  %s402_s15 = sshll.u32 (!%p216_p9), %s578_s5, 3 }
  0x12   : > { %s398_s14 = sshll.u32 (!%p216_p9), %s241_s13, 3  ;;  %s330_s18 = scalar_lea.hbm (!%p216_p9), %s669_s6, %s402_s15 }
  0x13   : > { %s243_s21 = scalar_lea.vmem (!%p216_p9), [#allocation3], %s398_s14  ;;  %s472_s12 = scalar_lea.hbm (!%p216_p9), %s669_s6, 24 }
  0x15   : > { %v252_v0 = vld [vmem:[%s664_s1 + $0x18] sm:$0xff]  ;;  %v251_v1 = vld [vmem:[%s664_s1 + $0x10] sm:$0xff]  ;;  %v250_v2 = vld [vmem:[%s664_s1 + $0x8] sm:$0xff]  ;;  %s245_s16 = scalar_select %p244_p10, %s578_s5, 2  ;;  %vm257_vm0 = vcmask 261120   ;;  %v516_v5 = vmov 1   ;;  %v283_v9 = vstv %s281_s27 }
  0x16   : > { %273 = vmatpush.msra.mxu0 %v252_v0  ;;  %v249_v3 = vld [vmem:[%s664_s1] sm:$0xff]  ;;  %448 = vset.pattern.permute.xlu1 %v516_v5  ;;  %v517_v6 = vmov 0   ;;  %s334_s27 = sshll.u32 %s330_s18, 4  ;;  %s320_s5 = scalar_lea.sflag [#allocation4], %s241_s13  ;;  %s335_s27 = int_to_ptr.hbm [resolvable:$true] %s334_s27 }
  0x17   : > { %s399_s19 = sshll.u32 %s245_s16, 3  ;;  %447 = vset.pattern.permute.xlu0 %v517_v6  ;;  %v450_v7 = vld [vmem:[%s665_s2] ss:$0 sm:$0xff]  ;;  %s466_s29 = sshra.s32 %s335_s27, 4  ;;  %s467_s29 = int_to_ptr.hbm [resolvable:$true] %s466_s29 }
  0x18   : > { %274 = vmatpush.msra.mxu0 %v251_v1  ;;  %s247_s22 = scalar_lea.vmem %s663_s0, %s399_s19  ;;  %v286_v16 = vld [vmem:[%s666_s3] sm:$0x3]  ;;  %s468_s30 = scalar_lea.hbm %s467_s29, 8 }
  0x19   : > { %v248_v4 = vld [vmem:[%s247_s22] sm:$0xff]  ;;  %v292_v17 = vperm.slane %v286_v16, 0  ;;  %v298_v20 = vperm.slane %v286_v16, 1  ;;  %s332_s22 = sshll.u32 %s243_s21, 4  ;;  %p469_p11 = scmp.ne.s32.totalorder %s467_s29, %s468_s30  ;;  %s333_s22 = int_to_ptr.vmem [resolvable:$true] %s332_s22 }
  0x1a   : > { %275 = vmatpush.msra.mxu0 %v250_v2  ;;  %v451_v23 = vld [vmem:[%s667_s4] ss:$0 sm:$0xff]  ;;  %p473_p0 = scmp.lt.s32.totalorder %s467_s29, %s669_s6  ;;  %p474_p1 = scmp.lt.s32.totalorder %s472_s12, %s468_s30 }
  0x1b   : > { %p470_p12 = pnand %p469_p11, %p595_p5 }
  0x1c   : > { %276 = vmatpush.msra.mxu0 %v249_v3  ;;  %p475_p2 = por %p474_p1, %p473_p0 }
  0x1d   : > { %400 = vmatmul.msk.f32.vlgmr.msra.gmra.mxu0 %vm257_vm0, %v248_v4  ;;  %p471_p13 = pneg %p470_p12 }
  0x1f   : > { %p476_p3 = pnand %p475_p2, %p471_p13 }
  0x9a   : > { %v278_v8 = vpop.f32.mrf.mxu0 }
  0x9b   : > { %v279_v10 = vadd.f32 %v450_v7, %v278_v8 }
  0x9d   : > { %v284_v11 = vmul.f32 %v283_v9, %v279_v10  ;;  %vm282_vm1 = vcmp.gt.f32.partialorder %v279_v10, 0.0 }
  0x9f   : > { %v285_v12 = vsel %vm282_vm1, %v279_v10, %v284_v11 }
  0xa0   : > { %295 = vperm.xlu1 %448, %v285_v12   ;;  %v301_v13 = vmul.f32 %v285_v12, %v285_v12 }
  0xa2   : > { %303 = vrot.lane.b32.xlu0 %v301_v13, %s518_s10 }
  0xa8   : > { %449 = vset.pattern.permute.xlu1 %v517_v6 }
  0xaa   : > { %289 = vperm.xlu0 %447, %v285_v12  }
 0x112   : > { %v296_v18 = vpop.permute.xlu1 %295 }
 0x113   : > { %v299_v22 = vmul.f32 %v298_v20, %v296_v18 }
 0x114   : > { %v304_v14 = vpop.permute.xlu0 %303 }
 0x115   : > { %v306_v15 = vadd.f32 %v304_v14, %v301_v13 }
 0x117   : > { %309 = vperm.xlu1 %449, %v306_v15  }
 0x11c   : > { %v290_v19 = vpop.permute.xlu0 %289 }
 0x11d   : > { %v293_v21 = vmul.f32 %v292_v17, %v290_v19 }
 0x11f   : > { %v300_v24 = vadd.f32 %v299_v22, %v293_v21 }
 0x189   : > { %v310_v25 = vpop.permute.xlu1 %309 }
 0x18a   : > { %v312_v26 = vsub.f32 %v300_v24, %v310_v25 }
 0x18c   : > { %v317_v27 = vadd.f32 %v451_v23, %v312_v26 }
 0x18e   : > { %318 = vst [vmem:[%s243_s21] sm:$0xff] %v317_v27 }
 0x18f   : > { %479 = shalt.err (!%p476_p3)
}
 0x190   : > { %405 = dma.vmem_to_hbm [thread:$0]  (%p595_p5), %s333_s22, 128, %s335_s27, %s320_s5  }
 0x191 PF: > { %p411_p4 = scmp.ge.s32.totalorder %s514_s26, 2  ;;  %s346_s13 = sand.u32 1, %s502_s23  }
 0x192   : > { %s347_s16 = scalar_lea.sflag [#allocation4], %s346_s13 }
 0x193   : > { %p408_p7 = pnand %p411_p4, %p599_p6 }
 0x195   : > { %p409_p8 = pneg %p408_p7 }
 0x197   : > { %497 = dma.done.wait (%p409_p8), %s347_s16, 128  }
 0x198   : > { %499 = vsyncadd (%p409_p8), %s347_s16, 4294967168  ;;  %p17_p9 = scmp.ge.s32.totalorder %s582_s28, 5   ;;  %s672_s23 = smov %s506_s24 }
 0x199   : > { %s673_s24 = smov %s510_s25  ;;  %s674_s25 = smov %s593_s7 }
 0x19a   : > { %s675_s26 = smov %s582_s28  ;;  %19 = sbr.rel (!%p17_p9) target bundleno = 5 (0x5), region = 79 }
 0x19f   :  { %353 = vsyncpa [#allocation4], 1 }
 0x1a0   :  { %355 = vsyncpa [#allocation4 + $0x1], 1 }

</bundles_post_ra>
